<compile_context>
chip_gen: v6e
topology: v6e:2x2x1
jax: 0.10.0
libtpu: 0.0.40
codegen_flags: <defaults>
</compile_context>

<pallas_src>
import math

import jax
import jax.numpy as jnp
from jax.experimental import pallas as pl
from jax.experimental.pallas import tpu as pltpu


def _char_lstm_kernel(x_ref, h0_ref, c0_ref,
                      w_x_ref, b_x_ref, w_hh_ref,
                      w_head_ref, b_head_ref,
                      out_ref):
    # Static shapes (Python ints at trace time).
    TB = x_ref.shape[0]               # T * B_pad rows, time-major
    Bp, H = h0_ref.shape
    T = TB // Bp
    O = w_head_ref.shape[1]

    # ---- Pre-loop: folded (embedding o input-gate) projection, biases included ----
    # gates_x[t*Bp:(t+1)*Bp] are the x-side gate pre-activations for step t,
    # gate order [i, f, o, g], with b_emb@w_ih + b_ih + b_hh already folded in.
    gates_x = (jnp.dot(x_ref[...], w_x_ref[...], preferred_element_type=jnp.float32)
               + b_x_ref[...])                                      # (T*Bp, 4H)

    w_hh = w_hh_ref[...]              # (H, 4H) stacked [i, f, o, g]

    # ---- Serial recurrence: one fused (Bp,H)x(H,4H) matmul per step, fully unrolled ----
    h = h0_ref[...]                   # (Bp, H)
    c = c0_ref[...]                   # (Bp, H)
    for t in range(T):
        gx = gates_x[t * Bp:(t + 1) * Bp, :]                        # (8, 128) tile-aligned
        g = gx + jnp.dot(h, w_hh, preferred_element_type=jnp.float32)
        sig = jax.nn.sigmoid(g[:, :3 * H])                          # i | f | o contiguous
        i_g = sig[:, 0 * H:1 * H]
        f_g = sig[:, 1 * H:2 * H]
        o_g = sig[:, 2 * H:3 * H]
        g_g = jnp.tanh(g[:, 3 * H:4 * H])
        c = f_g * c + i_g * g_g
        h = o_g * jnp.tanh(c)

    # ---- Folded output head on last-timestep hidden state ----
    logits = (jnp.dot(h, w_head_ref[...], preferred_element_type=jnp.float32)
              + b_head_ref[...])                                    # (Bp, O)

    # log_softmax along last axis (numerically stable)
    m = jnp.max(logits, axis=-1, keepdims=True)
    z = logits - m
    lse = jnp.log(jnp.sum(jnp.exp(z), axis=-1, keepdims=True))
    logp = z - lse

    # ---- Lane-dense packed output: [logp | h | c | zero-pad] -> one (Bp, 128) store ----
    pad_w = out_ref.shape[1] - (O + 2 * H)
    pieces = [logp, h, c]
    if pad_w > 0:
        pieces.append(jnp.zeros((Bp, pad_w), jnp.float32))
    out_ref[...] = jnp.concatenate(pieces, axis=1)


def char_gru_lstm_forward(x, hidden, cell, params):
    """x: (B, T, I); hidden/cell: (1, B, H) as in PyTorch nn.LSTM."""
    B, T, I = x.shape
    H = hidden.shape[-1]
    O = params["w_out"].shape[-1]

    # Pad batch to one f32 sublane tile so per-step slices are (8, 128)-aligned.
    Bp = ((B + 7) // 8) * 8
    pad = Bp - B
    x_p = jnp.pad(x, ((0, pad), (0, 0), (0, 0)))
    h0 = jnp.pad(hidden.reshape(B, H), ((0, pad), (0, 0)))
    c0 = jnp.pad(cell.reshape(B, H), ((0, pad), (0, 0)))

    # Time-major, then flatten to (T*Bp, I) so the kernel does one big x-side matmul.
    x_tm = jnp.transpose(x_p, (1, 0, 2)).reshape(T * Bp, I)

    # Stack LSTM gate weights along the output axis, reordered from PyTorch's
    # [i, f, g, o] to [i, f, o, g] so sigmoid/tanh each act on one contiguous slice.
    order = (0, 1, 3, 2)
    w_ih_s = jnp.concatenate([params["w_ih"][k] for k in order], axis=1)   # (H, 4H)
    w_hh_s = jnp.concatenate([params["w_hh"][k] for k in order], axis=1)   # (H, 4H)
    b_gate = jnp.concatenate([params["b_ih"][k] + params["b_hh"][k]
                              for k in order], axis=1)                     # (1, 4H)

    # Fold embedding Linear (+ identity dropout) into the x-side gate projection.
    w_x = params["w_emb"] @ w_ih_s                                         # (I, 4H)
    b_x = params["b_emb"] @ w_ih_s + b_gate                                # (1, 4H)

    # Fold hidden2 o outputLayer into one head matmul (no activation between).
    w_head = params["w_h2"] @ params["w_out"]                              # (H, O)
    b_head = params["b_h2"] @ params["w_out"] + params["b_out"]            # (1, O)

    slab_w = ((O + 2 * H + 127) // 128) * 128
    vmem = pl.BlockSpec(memory_space=pltpu.MemorySpace.VMEM)

    slab = pl.pallas_call(
        _char_lstm_kernel,
        out_shape=jax.ShapeDtypeStruct((Bp, slab_w), jnp.float32),
        in_specs=[vmem] * 8,
        out_specs=vmem,
    )(x_tm, h0, c0, w_x, b_x, w_hh_s, w_head, b_head)

    logp = slab[:B, :O]
    hT = slab[:B, O:O + H]
    cT = slab[:B, O + H:O + 2 * H]
    return logp, hT[None], cT[None]


def init_params(key, input_size, hidden_size, hidden_size2, output_size):
    ks = jax.random.split(key, 12)

    def u(k, shape, fan_in):
        b = 1.0 / math.sqrt(fan_in)
        return jax.random.uniform(k, shape, jnp.float32, -b, b)

    I, H, H2, O = input_size, hidden_size, hidden_size2, output_size
    return {
        # embeddingLayer: Linear(I, H), stored transposed (in, out)
        "w_emb": u(ks[0], (I, H), I),
        "b_emb": u(ks[1], (1, H), I),
        # LSTM cell weights, PyTorch gate order [i, f, g, o], transposed per gate (in, out)
        "w_ih": u(ks[2], (4, H, H), H),
        "w_hh": u(ks[3], (4, H, H), H),
        "b_ih": u(ks[4], (4, 1, H), H),
        "b_hh": u(ks[5], (4, 1, H), H),
        # hidden2: Linear(H, H2)
        "w_h2": u(ks[6], (H, H2), H),
        "b_h2": u(ks[7], (1, H2), H),
        # outputLayer: Linear(H2, O)
        "w_out": u(ks[8], (H2, O), H2),
        "b_out": u(ks[9], (1, O), H2),
    }


def reference_forward(x, hidden, cell, params):
    """Pure-JAX reference of the same forward (PyTorch gate order), for a sanity check."""
    B, T, I = x.shape
    H = hidden.shape[-1]
    h = hidden.reshape(B, H)
    c = cell.reshape(B, H)
    for t in range(T):
        e_t = x[:, t, :] @ params["w_emb"] + params["b_emb"]
        gates = [e_t @ params["w_ih"][k] + h @ params["w_hh"][k]
                 + params["b_ih"][k] + params["b_hh"][k] for k in range(4)]
        i_g = jax.nn.sigmoid(gates[0])
        f_g = jax.nn.sigmoid(gates[1])
        g_g = jnp.tanh(gates[2])
        o_g = jax.nn.sigmoid(gates[3])
        c = f_g * c + i_g * g_g
        h = o_g * jnp.tanh(c)
    y = h @ params["w_h2"] + params["b_h2"]
    logits = y @ params["w_out"] + params["b_out"]
    return jax.nn.log_softmax(logits, axis=-1), h[None], c[None]


if __name__ == "__main__":
    # Small shapes implied by the module: batch=2, seq=8, input=16,
    # hidden=32, hidden2=32, output=16.
    B, T = 2, 8
    INPUT_SIZE, HIDDEN, HIDDEN2, OUTPUT_SIZE = 16, 32, 32, 16

    key = jax.random.PRNGKey(0)
    k_x, k_h, k_c, k_p = jax.random.split(key, 4)

    x = jax.random.normal(k_x, (B, T, INPUT_SIZE), jnp.float32)
    hidden = jax.random.normal(k_h, (1, B, HIDDEN), jnp.float32)   # init_hidden
    cell = jax.random.normal(k_c, (1, B, HIDDEN), jnp.float32)
    params = init_params(k_p, INPUT_SIZE, HIDDEN, HIDDEN2, OUTPUT_SIZE)

    logp, hT, cT = char_gru_lstm_forward(x, hidden, cell, params)
    jax.block_until_ready((logp, hT, cT))

    # sanity check vs. pure-JAX reference
    ref_logp, ref_h, ref_c = reference_forward(x, hidden, cell, params)
    assert jnp.allclose(logp, ref_logp, atol=1e-4, rtol=1e-4)
    assert jnp.allclose(hT, ref_h, atol=1e-4, rtol=1e-4)
    assert jnp.allclose(cT, ref_c, atol=1e-4, rtol=1e-4)

    print("KERNEL_OK")
</pallas_src>

<mosaic_0001>
module attributes {stable_mosaic.version = 11 : i64} {
  func.func @_char_lstm_kernel(%arg0: memref<64x16xf32, #tpu.memory_space<vmem>>, %arg1: memref<8x32xf32, #tpu.memory_space<vmem>>, %arg2: memref<8x32xf32, #tpu.memory_space<vmem>>, %arg3: memref<16x128xf32, #tpu.memory_space<vmem>>, %arg4: memref<1x128xf32, #tpu.memory_space<vmem>>, %arg5: memref<32x128xf32, #tpu.memory_space<vmem>>, %arg6: memref<32x16xf32, #tpu.memory_space<vmem>>, %arg7: memref<1x16xf32, #tpu.memory_space<vmem>>, %arg8: memref<8x128xf32, #tpu.memory_space<vmem>>) attributes {dimension_semantics = [], scalar_prefetch = 0 : i64, scratch_operands = 0 : i64, tpu.core_type = #tpu.core_type<tc>} {
    %c0 = arith.constant 0 : index
    %c0_0 = arith.constant 0 : index
    %0 = vector.load %arg0[%c0, %c0_0] : memref<64x16xf32, #tpu.memory_space<vmem>>, vector<64x16xf32>
    %c0_1 = arith.constant 0 : index
    %c0_2 = arith.constant 0 : index
    %1 = vector.load %arg3[%c0_1, %c0_2] : memref<16x128xf32, #tpu.memory_space<vmem>>, vector<16x128xf32>
    %cst = arith.constant dense<0.000000e+00> : vector<64x128xf32>
    %2 = tpu.matmul %0, %1, %cst {dimension_numbers = #tpu.dot_dimension_numbers<[1], [0], [0], [1], [0, 0, 1, 1], [], []>} : vector<64x16xf32>, vector<16x128xf32>, vector<64x128xf32> -> vector<64x128xf32>
    %c0_3 = arith.constant 0 : index
    %c0_4 = arith.constant 0 : index
    %3 = vector.load %arg4[%c0_3, %c0_4] : memref<1x128xf32, #tpu.memory_space<vmem>>, vector<1x128xf32>
    %4 = vector.broadcast %3 : vector<1x128xf32> to vector<64x128xf32>
    %5 = arith.addf %2, %4 : vector<64x128xf32>
    %c0_5 = arith.constant 0 : index
    %c0_6 = arith.constant 0 : index
    %6 = vector.load %arg5[%c0_5, %c0_6] : memref<32x128xf32, #tpu.memory_space<vmem>>, vector<32x128xf32>
    %c0_7 = arith.constant 0 : index
    %c0_8 = arith.constant 0 : index
    %7 = vector.load %arg1[%c0_7, %c0_8] : memref<8x32xf32, #tpu.memory_space<vmem>>, vector<8x32xf32>
    %c0_9 = arith.constant 0 : index
    %c0_10 = arith.constant 0 : index
    %8 = vector.load %arg2[%c0_9, %c0_10] : memref<8x32xf32, #tpu.memory_space<vmem>>, vector<8x32xf32>
    %9 = vector.extract_strided_slice %5 {offsets = [0, 0], sizes = [8, 128], strides = [1, 1]} : vector<64x128xf32> to vector<8x128xf32>
    %cst_11 = arith.constant dense<0.000000e+00> : vector<8x128xf32>
    %10 = tpu.matmul %7, %6, %cst_11 {dimension_numbers = #tpu.dot_dimension_numbers<[1], [0], [0], [1], [0, 0, 1, 1], [], []>} : vector<8x32xf32>, vector<32x128xf32>, vector<8x128xf32> -> vector<8x128xf32>
    %11 = arith.addf %9, %10 : vector<8x128xf32>
    %12 = vector.extract_strided_slice %11 {offsets = [0, 0], sizes = [8, 96], strides = [1, 1]} : vector<8x128xf32> to vector<8x96xf32>
    %13 = arith.negf %12 : vector<8x96xf32>
    %14 = math.exp %13 : vector<8x96xf32>
    %cst_12 = arith.constant 1.000000e+00 : f32
    %15 = vector.broadcast %cst_12 : f32 to vector<8x96xf32>
    %16 = arith.addf %15, %14 : vector<8x96xf32>
    %17 = arith.divf %15, %16 : vector<8x96xf32>
    %18 = vector.extract_strided_slice %17 {offsets = [0, 0], sizes = [8, 32], strides = [1, 1]} : vector<8x96xf32> to vector<8x32xf32>
    %19 = vector.extract_strided_slice %17 {offsets = [0, 32], sizes = [8, 32], strides = [1, 1]} : vector<8x96xf32> to vector<8x32xf32>
    %20 = vector.extract_strided_slice %17 {offsets = [0, 64], sizes = [8, 32], strides = [1, 1]} : vector<8x96xf32> to vector<8x32xf32>
    %21 = vector.extract_strided_slice %11 {offsets = [0, 96], sizes = [8, 32], strides = [1, 1]} : vector<8x128xf32> to vector<8x32xf32>
    %22 = math.tanh %21 : vector<8x32xf32>
    %23 = arith.mulf %19, %8 : vector<8x32xf32>
    %24 = arith.mulf %18, %22 : vector<8x32xf32>
    %25 = arith.addf %23, %24 : vector<8x32xf32>
    %26 = math.tanh %25 : vector<8x32xf32>
    %27 = arith.mulf %20, %26 : vector<8x32xf32>
    %28 = vector.extract_strided_slice %5 {offsets = [8, 0], sizes = [8, 128], strides = [1, 1]} : vector<64x128xf32> to vector<8x128xf32>
    %cst_13 = arith.constant dense<0.000000e+00> : vector<8x128xf32>
    %29 = tpu.matmul %27, %6, %cst_13 {dimension_numbers = #tpu.dot_dimension_numbers<[1], [0], [0], [1], [0, 0, 1, 1], [], []>} : vector<8x32xf32>, vector<32x128xf32>, vector<8x128xf32> -> vector<8x128xf32>
    %30 = arith.addf %28, %29 : vector<8x128xf32>
    %31 = vector.extract_strided_slice %30 {offsets = [0, 0], sizes = [8, 96], strides = [1, 1]} : vector<8x128xf32> to vector<8x96xf32>
    %32 = arith.negf %31 : vector<8x96xf32>
    %33 = math.exp %32 : vector<8x96xf32>
    %cst_14 = arith.constant 1.000000e+00 : f32
    %34 = vector.broadcast %cst_14 : f32 to vector<8x96xf32>
    %35 = arith.addf %34, %33 : vector<8x96xf32>
    %36 = arith.divf %34, %35 : vector<8x96xf32>
    %37 = vector.extract_strided_slice %36 {offsets = [0, 0], sizes = [8, 32], strides = [1, 1]} : vector<8x96xf32> to vector<8x32xf32>
    %38 = vector.extract_strided_slice %36 {offsets = [0, 32], sizes = [8, 32], strides = [1, 1]} : vector<8x96xf32> to vector<8x32xf32>
    %39 = vector.extract_strided_slice %36 {offsets = [0, 64], sizes = [8, 32], strides = [1, 1]} : vector<8x96xf32> to vector<8x32xf32>
    %40 = vector.extract_strided_slice %30 {offsets = [0, 96], sizes = [8, 32], strides = [1, 1]} : vector<8x128xf32> to vector<8x32xf32>
    %41 = math.tanh %40 : vector<8x32xf32>
    %42 = arith.mulf %38, %25 : vector<8x32xf32>
    %43 = arith.mulf %37, %41 : vector<8x32xf32>
    %44 = arith.addf %42, %43 : vector<8x32xf32>
    %45 = math.tanh %44 : vector<8x32xf32>
    %46 = arith.mulf %39, %45 : vector<8x32xf32>
    %47 = vector.extract_strided_slice %5 {offsets = [16, 0], sizes = [8, 128], strides = [1, 1]} : vector<64x128xf32> to vector<8x128xf32>
    %cst_15 = arith.constant dense<0.000000e+00> : vector<8x128xf32>
    %48 = tpu.matmul %46, %6, %cst_15 {dimension_numbers = #tpu.dot_dimension_numbers<[1], [0], [0], [1], [0, 0, 1, 1], [], []>} : vector<8x32xf32>, vector<32x128xf32>, vector<8x128xf32> -> vector<8x128xf32>
    %49 = arith.addf %47, %48 : vector<8x128xf32>
    %50 = vector.extract_strided_slice %49 {offsets = [0, 0], sizes = [8, 96], strides = [1, 1]} : vector<8x128xf32> to vector<8x96xf32>
    %51 = arith.negf %50 : vector<8x96xf32>
    %52 = math.exp %51 : vector<8x96xf32>
    %cst_16 = arith.constant 1.000000e+00 : f32
    %53 = vector.broadcast %cst_16 : f32 to vector<8x96xf32>
    %54 = arith.addf %53, %52 : vector<8x96xf32>
    %55 = arith.divf %53, %54 : vector<8x96xf32>
    %56 = vector.extract_strided_slice %55 {offsets = [0, 0], sizes = [8, 32], strides = [1, 1]} : vector<8x96xf32> to vector<8x32xf32>
    %57 = vector.extract_strided_slice %55 {offsets = [0, 32], sizes = [8, 32], strides = [1, 1]} : vector<8x96xf32> to vector<8x32xf32>
    %58 = vector.extract_strided_slice %55 {offsets = [0, 64], sizes = [8, 32], strides = [1, 1]} : vector<8x96xf32> to vector<8x32xf32>
    %59 = vector.extract_strided_slice %49 {offsets = [0, 96], sizes = [8, 32], strides = [1, 1]} : vector<8x128xf32> to vector<8x32xf32>
    %60 = math.tanh %59 : vector<8x32xf32>
    %61 = arith.mulf %57, %44 : vector<8x32xf32>
    %62 = arith.mulf %56, %60 : vector<8x32xf32>
    %63 = arith.addf %61, %62 : vector<8x32xf32>
    %64 = math.tanh %63 : vector<8x32xf32>
    %65 = arith.mulf %58, %64 : vector<8x32xf32>
    %66 = vector.extract_strided_slice %5 {offsets = [24, 0], sizes = [8, 128], strides = [1, 1]} : vector<64x128xf32> to vector<8x128xf32>
    %cst_17 = arith.constant dense<0.000000e+00> : vector<8x128xf32>
    %67 = tpu.matmul %65, %6, %cst_17 {dimension_numbers = #tpu.dot_dimension_numbers<[1], [0], [0], [1], [0, 0, 1, 1], [], []>} : vector<8x32xf32>, vector<32x128xf32>, vector<8x128xf32> -> vector<8x128xf32>
    %68 = arith.addf %66, %67 : vector<8x128xf32>
    %69 = vector.extract_strided_slice %68 {offsets = [0, 0], sizes = [8, 96], strides = [1, 1]} : vector<8x128xf32> to vector<8x96xf32>
    %70 = arith.negf %69 : vector<8x96xf32>
    %71 = math.exp %70 : vector<8x96xf32>
    %cst_18 = arith.constant 1.000000e+00 : f32
    %72 = vector.broadcast %cst_18 : f32 to vector<8x96xf32>
    %73 = arith.addf %72, %71 : vector<8x96xf32>
    %74 = arith.divf %72, %73 : vector<8x96xf32>
    %75 = vector.extract_strided_slice %74 {offsets = [0, 0], sizes = [8, 32], strides = [1, 1]} : vector<8x96xf32> to vector<8x32xf32>
    %76 = vector.extract_strided_slice %74 {offsets = [0, 32], sizes = [8, 32], strides = [1, 1]} : vector<8x96xf32> to vector<8x32xf32>
    %77 = vector.extract_strided_slice %74 {offsets = [0, 64], sizes = [8, 32], strides = [1, 1]} : vector<8x96xf32> to vector<8x32xf32>
    %78 = vector.extract_strided_slice %68 {offsets = [0, 96], sizes = [8, 32], strides = [1, 1]} : vector<8x128xf32> to vector<8x32xf32>
    %79 = math.tanh %78 : vector<8x32xf32>
    %80 = arith.mulf %76, %63 : vector<8x32xf32>
    %81 = arith.mulf %75, %79 : vector<8x32xf32>
    %82 = arith.addf %80, %81 : vector<8x32xf32>
    %83 = math.tanh %82 : vector<8x32xf32>
    %84 = arith.mulf %77, %83 : vector<8x32xf32>
    %85 = vector.extract_strided_slice %5 {offsets = [32, 0], sizes = [8, 128], strides = [1, 1]} : vector<64x128xf32> to vector<8x128xf32>
    %cst_19 = arith.constant dense<0.000000e+00> : vector<8x128xf32>
    %86 = tpu.matmul %84, %6, %cst_19 {dimension_numbers = #tpu.dot_dimension_numbers<[1], [0], [0], [1], [0, 0, 1, 1], [], []>} : vector<8x32xf32>, vector<32x128xf32>, vector<8x128xf32> -> vector<8x128xf32>
    %87 = arith.addf %85, %86 : vector<8x128xf32>
    %88 = vector.extract_strided_slice %87 {offsets = [0, 0], sizes = [8, 96], strides = [1, 1]} : vector<8x128xf32> to vector<8x96xf32>
    %89 = arith.negf %88 : vector<8x96xf32>
    %90 = math.exp %89 : vector<8x96xf32>
    %cst_20 = arith.constant 1.000000e+00 : f32
    %91 = vector.broadcast %cst_20 : f32 to vector<8x96xf32>
    %92 = arith.addf %91, %90 : vector<8x96xf32>
    %93 = arith.divf %91, %92 : vector<8x96xf32>
    %94 = vector.extract_strided_slice %93 {offsets = [0, 0], sizes = [8, 32], strides = [1, 1]} : vector<8x96xf32> to vector<8x32xf32>
    %95 = vector.extract_strided_slice %93 {offsets = [0, 32], sizes = [8, 32], strides = [1, 1]} : vector<8x96xf32> to vector<8x32xf32>
    %96 = vector.extract_strided_slice %93 {offsets = [0, 64], sizes = [8, 32], strides = [1, 1]} : vector<8x96xf32> to vector<8x32xf32>
    %97 = vector.extract_strided_slice %87 {offsets = [0, 96], sizes = [8, 32], strides = [1, 1]} : vector<8x128xf32> to vector<8x32xf32>
    %98 = math.tanh %97 : vector<8x32xf32>
    %99 = arith.mulf %95, %82 : vector<8x32xf32>
    %100 = arith.mulf %94, %98 : vector<8x32xf32>
    %101 = arith.addf %99, %100 : vector<8x32xf32>
    %102 = math.tanh %101 : vector<8x32xf32>
    %103 = arith.mulf %96, %102 : vector<8x32xf32>
    %104 = vector.extract_strided_slice %5 {offsets = [40, 0], sizes = [8, 128], strides = [1, 1]} : vector<64x128xf32> to vector<8x128xf32>
    %cst_21 = arith.constant dense<0.000000e+00> : vector<8x128xf32>
    %105 = tpu.matmul %103, %6, %cst_21 {dimension_numbers = #tpu.dot_dimension_numbers<[1], [0], [0], [1], [0, 0, 1, 1], [], []>} : vector<8x32xf32>, vector<32x128xf32>, vector<8x128xf32> -> vector<8x128xf32>
    %106 = arith.addf %104, %105 : vector<8x128xf32>
    %107 = vector.extract_strided_slice %106 {offsets = [0, 0], sizes = [8, 96], strides = [1, 1]} : vector<8x128xf32> to vector<8x96xf32>
    %108 = arith.negf %107 : vector<8x96xf32>
    %109 = math.exp %108 : vector<8x96xf32>
    %cst_22 = arith.constant 1.000000e+00 : f32
    %110 = vector.broadcast %cst_22 : f32 to vector<8x96xf32>
    %111 = arith.addf %110, %109 : vector<8x96xf32>
    %112 = arith.divf %110, %111 : vector<8x96xf32>
    %113 = vector.extract_strided_slice %112 {offsets = [0, 0], sizes = [8, 32], strides = [1, 1]} : vector<8x96xf32> to vector<8x32xf32>
    %114 = vector.extract_strided_slice %112 {offsets = [0, 32], sizes = [8, 32], strides = [1, 1]} : vector<8x96xf32> to vector<8x32xf32>
    %115 = vector.extract_strided_slice %112 {offsets = [0, 64], sizes = [8, 32], strides = [1, 1]} : vector<8x96xf32> to vector<8x32xf32>
    %116 = vector.extract_strided_slice %106 {offsets = [0, 96], sizes = [8, 32], strides = [1, 1]} : vector<8x128xf32> to vector<8x32xf32>
    %117 = math.tanh %116 : vector<8x32xf32>
    %118 = arith.mulf %114, %101 : vector<8x32xf32>
    %119 = arith.mulf %113, %117 : vector<8x32xf32>
    %120 = arith.addf %118, %119 : vector<8x32xf32>
    %121 = math.tanh %120 : vector<8x32xf32>
    %122 = arith.mulf %115, %121 : vector<8x32xf32>
    %123 = vector.extract_strided_slice %5 {offsets = [48, 0], sizes = [8, 128], strides = [1, 1]} : vector<64x128xf32> to vector<8x128xf32>
    %cst_23 = arith.constant dense<0.000000e+00> : vector<8x128xf32>
    %124 = tpu.matmul %122, %6, %cst_23 {dimension_numbers = #tpu.dot_dimension_numbers<[1], [0], [0], [1], [0, 0, 1, 1], [], []>} : vector<8x32xf32>, vector<32x128xf32>, vector<8x128xf32> -> vector<8x128xf32>
    %125 = arith.addf %123, %124 : vector<8x128xf32>
    %126 = vector.extract_strided_slice %125 {offsets = [0, 0], sizes = [8, 96], strides = [1, 1]} : vector<8x128xf32> to vector<8x96xf32>
    %127 = arith.negf %126 : vector<8x96xf32>
    %128 = math.exp %127 : vector<8x96xf32>
    %cst_24 = arith.constant 1.000000e+00 : f32
    %129 = vector.broadcast %cst_24 : f32 to vector<8x96xf32>
    %130 = arith.addf %129, %128 : vector<8x96xf32>
    %131 = arith.divf %129, %130 : vector<8x96xf32>
    %132 = vector.extract_strided_slice %131 {offsets = [0, 0], sizes = [8, 32], strides = [1, 1]} : vector<8x96xf32> to vector<8x32xf32>
    %133 = vector.extract_strided_slice %131 {offsets = [0, 32], sizes = [8, 32], strides = [1, 1]} : vector<8x96xf32> to vector<8x32xf32>
    %134 = vector.extract_strided_slice %131 {offsets = [0, 64], sizes = [8, 32], strides = [1, 1]} : vector<8x96xf32> to vector<8x32xf32>
    %135 = vector.extract_strided_slice %125 {offsets = [0, 96], sizes = [8, 32], strides = [1, 1]} : vector<8x128xf32> to vector<8x32xf32>
    %136 = math.tanh %135 : vector<8x32xf32>
    %137 = arith.mulf %133, %120 : vector<8x32xf32>
    %138 = arith.mulf %132, %136 : vector<8x32xf32>
    %139 = arith.addf %137, %138 : vector<8x32xf32>
    %140 = math.tanh %139 : vector<8x32xf32>
    %141 = arith.mulf %134, %140 : vector<8x32xf32>
    %142 = vector.extract_strided_slice %5 {offsets = [56, 0], sizes = [8, 128], strides = [1, 1]} : vector<64x128xf32> to vector<8x128xf32>
    %cst_25 = arith.constant dense<0.000000e+00> : vector<8x128xf32>
    %143 = tpu.matmul %141, %6, %cst_25 {dimension_numbers = #tpu.dot_dimension_numbers<[1], [0], [0], [1], [0, 0, 1, 1], [], []>} : vector<8x32xf32>, vector<32x128xf32>, vector<8x128xf32> -> vector<8x128xf32>
    %144 = arith.addf %142, %143 : vector<8x128xf32>
    %145 = vector.extract_strided_slice %144 {offsets = [0, 0], sizes = [8, 96], strides = [1, 1]} : vector<8x128xf32> to vector<8x96xf32>
    %146 = arith.negf %145 : vector<8x96xf32>
    %147 = math.exp %146 : vector<8x96xf32>
    %cst_26 = arith.constant 1.000000e+00 : f32
    %148 = vector.broadcast %cst_26 : f32 to vector<8x96xf32>
    %149 = arith.addf %148, %147 : vector<8x96xf32>
    %150 = arith.divf %148, %149 : vector<8x96xf32>
    %151 = vector.extract_strided_slice %150 {offsets = [0, 0], sizes = [8, 32], strides = [1, 1]} : vector<8x96xf32> to vector<8x32xf32>
    %152 = vector.extract_strided_slice %150 {offsets = [0, 32], sizes = [8, 32], strides = [1, 1]} : vector<8x96xf32> to vector<8x32xf32>
    %153 = vector.extract_strided_slice %150 {offsets = [0, 64], sizes = [8, 32], strides = [1, 1]} : vector<8x96xf32> to vector<8x32xf32>
    %154 = vector.extract_strided_slice %144 {offsets = [0, 96], sizes = [8, 32], strides = [1, 1]} : vector<8x128xf32> to vector<8x32xf32>
    %155 = math.tanh %154 : vector<8x32xf32>
    %156 = arith.mulf %152, %139 : vector<8x32xf32>
    %157 = arith.mulf %151, %155 : vector<8x32xf32>
    %158 = arith.addf %156, %157 : vector<8x32xf32>
    %159 = math.tanh %158 : vector<8x32xf32>
    %160 = arith.mulf %153, %159 : vector<8x32xf32>
    %c0_27 = arith.constant 0 : index
    %c0_28 = arith.constant 0 : index
    %161 = vector.load %arg6[%c0_27, %c0_28] : memref<32x16xf32, #tpu.memory_space<vmem>>, vector<32x16xf32>
    %cst_29 = arith.constant dense<0.000000e+00> : vector<8x16xf32>
    %162 = tpu.matmul %160, %161, %cst_29 {dimension_numbers = #tpu.dot_dimension_numbers<[1], [0], [0], [1], [0, 0, 1, 1], [], []>} : vector<8x32xf32>, vector<32x16xf32>, vector<8x16xf32> -> vector<8x16xf32>
    %c0_30 = arith.constant 0 : index
    %c0_31 = arith.constant 0 : index
    %163 = vector.load %arg7[%c0_30, %c0_31] : memref<1x16xf32, #tpu.memory_space<vmem>>, vector<1x16xf32>
    %164 = vector.broadcast %163 : vector<1x16xf32> to vector<8x16xf32>
    %165 = arith.addf %162, %164 : vector<8x16xf32>
    %cst_32 = arith.constant dense<0xFF800000> : vector<8xf32>
    %166 = vector.multi_reduction <maximumf>, %165, %cst_32 [1] : vector<8x16xf32> to vector<8xf32>
    %167 = vector.shape_cast %166 : vector<8xf32> to vector<8x1xf32>
    %168 = vector.broadcast %167 : vector<8x1xf32> to vector<8x16xf32>
    %169 = arith.subf %165, %168 : vector<8x16xf32>
    %170 = math.exp %169 : vector<8x16xf32>
    %cst_33 = arith.constant dense<0.000000e+00> : vector<8xf32>
    %171 = vector.multi_reduction <add>, %170, %cst_33 [1] : vector<8x16xf32> to vector<8xf32>
    %172 = vector.shape_cast %171 : vector<8xf32> to vector<8x1xf32>
    %173 = math.log %172 : vector<8x1xf32>
    %174 = vector.broadcast %173 : vector<8x1xf32> to vector<8x16xf32>
    %175 = arith.subf %169, %174 : vector<8x16xf32>
    %cst_34 = arith.constant 0.000000e+00 : f32
    %176 = vector.broadcast %cst_34 : f32 to vector<8x48xf32>
    %177 = tpu.concatenate %175, %160, %158, %176 in 1 : vector<8x16xf32>, vector<8x32xf32>, vector<8x32xf32>, vector<8x48xf32> -> vector<8x128xf32>
    %c0_35 = arith.constant 0 : index
    %c0_36 = arith.constant 0 : index
    %178 = vector.load %arg8[%c0_35, %c0_36] : memref<8x128xf32, #tpu.memory_space<vmem>>, vector<8x128xf32>
    tpu.vector_store %arg8[%c0_35, %c0_36], %177 {strides = array<i32>} : memref<8x128xf32, #tpu.memory_space<vmem>>, vector<8x128xf32>,
    return
  }
}

</mosaic_0001>

<bundles_post_ra>
// kernel: tpu_custom_call.1
= control target key start
LH: loop header
LB: loop body
LE: loop exit
PB: predicated region body
PF: predicated region fallthrough
CT: control target
= control target key end

     0   :  { %v1405_v3 = vmov 0.0   ;;  %vm47_vm0 = vcmask 130048   ;;  %s1695_s0 = inlined_call_operand.vmem [shape: f32[64,16], index: 0, kind: input, shape index: {}]   ;;  %s1696_s1 = inlined_call_operand.vmem [shape: f32[8,32], index: 1, kind: input, shape index: {}]   ;;  %s1697_s2 = inlined_call_operand.vmem [shape: f32[8,32], index: 2, kind: input, shape index: {}]   ;;  %s1698_s3 = inlined_call_operand.vmem [shape: f32[16,128], index: 3, kind: input, shape index: {}]   ;;  %s1699_s4 = inlined_call_operand.vmem [shape: f32[1,128], index: 4, kind: input, shape index: {}]   ;;  %s1700_s5 = inlined_call_operand.vmem [shape: f32[32,128], index: 5, kind: input, shape index: {}]   ;;  %s1701_s6 = inlined_call_operand.vmem [shape: f32[32,16], index: 6, kind: input, shape index: {}]   ;;  %s1702_s7 = inlined_call_operand.vmem [shape: f32[1,16], index: 7, kind: input, shape index: {}]   ;;  %s1703_s8 = inlined_call_operand.hbm [shape: f32[8,128], index: 8, kind: output, shape index: {}]  }
   0x1   :  { %v39_v0 = vld [vmem:[%s1698_s3 + $0x8] sm:$0xff]  ;;  %v1463_v1 = vld [vmem:[%s1700_s5 + $0x18] sm:$0xff]  ;;  %v38_v2 = vld [vmem:[%s1698_s3] sm:$0xff]  ;;  %1209 = vmatprep.subr.mxu1 %v1405_v3 }
   0x2   :  { %1193 = vmatprep.subr.mxu0 %v39_v0  ;;  %v30_v4 = vld [vmem:[%s1695_s0] sm:$0xff]  ;;  %1210 = vmatpush3.msra.mxu1 %v1463_v1  ;;  %v1476_v5 = vld [vmem:[%s1700_s5 + $0x10] sm:$0xff]  ;;  %v31_v6 = vld [vmem:[%s1695_s0 + $0x8] sm:$0xff] }
   0x3   :  { %1194 = vmatpush3.msra.mxu0 %v39_v0  ;;  %1211 = vmatprep.subr.mxu1 %v1405_v3 }
   0x4   :  { %1195 = vmatprep.subr.mxu0 %v38_v2 }
   0x5   :  { %13 = vsyncpa [#allocation3], 0  ;;  %1196 = vmatpush3.msra.mxu0 %v38_v2  ;;  %1197 = vmatprep.mubr.msk.f32.mxu0 %vm47_vm0, %v30_v4  ;;  %v1486_v7 = vld [vmem:[%s1700_s5 + $0x8] sm:$0xff]  ;;  %v1494_v8 = vld [vmem:[%s1700_s5] sm:$0xff]  ;;  %vm1406_vm1 = vmmov 0   ;;  %vm183_vm2 = vcmask 261120  }
   0x6   :  { %1212 = vmatpush3.msra.mxu1 %v1476_v5  ;;  %1198 = vmatmul.mubr.msk.f32.vlgmr.msra.gmra.mxu0 %vm47_vm0, %v31_v6  ;;  %v181_v9 = vld [vmem:[%s1696_s1] sm:$0xff]  ;;  %s1407_s22 = smov 32   ;;  %v32_v47 = vld [vmem:[%s1695_s0 + $0x10] sm:$0xff]  ;;  %v33_v48 = vld [vmem:[%s1695_s0 + $0x18] sm:$0xff]  ;;  %s1410_s1 = smov 80   ;;  %vm1092_vm3 = vcmask 392192  }
   0x7   :  { %1213 = vmatprep.subr.mxu1 %v1405_v3  ;;  %1217 = vmatprep.mubr.msk.f32.mxu1 %vm1406_vm1, %v1405_v3  ;;  %v1528_v11 = vld [vmem:[%s1699_s4] ss:$0 sm:$0xff]  ;;  %v35_v50 = vld [vmem:[%s1695_s0 + $0x28] sm:$0xff]  ;;  %v36_v51 = vld [vmem:[%s1695_s0 + $0x30] sm:$0xff]  ;;  %vm1094_vm4 = vcmask 654336  }
   0x8   :  { %1214 = vmatpush3.msra.mxu1 %v1486_v7  ;;  %1231 = vmatprep.subr.mxu0 %v1405_v3  ;;  %v182_v18 = vld [vmem:[%s1697_s2] sm:$0xff]  ;;  %s1408_s2 = smov 64   ;;  %v37_v52 = vld [vmem:[%s1695_s0 + $0x38] sm:$0xff] }
   0x9   :  { %1215 = vmatprep.subr.mxu1 %v1405_v3  ;;  %1232 = vmatpush3.msra.mxu0 %v1463_v1  ;;  %v34_v49 = vld [vmem:[%s1695_s0 + $0x20] sm:$0xff] }
   0xa   :  { %1216 = vmatpush3.msra.mxu1 %v1494_v8  ;;  %1233 = vmatprep.subr.mxu0 %v1405_v3 }
   0xb   :  { %1218 = vmatmul.mubr.msk.f32.vlgmr.msra.gmra.mxu1 %vm183_vm2, %v181_v9  ;;  %1220 = vmatprep.subr.mxu1 %v1405_v3 }
   0xc   :  { %1221 = vmatpush3.msra.mxu1 %v1463_v1  ;;  %1228 = vmatprep.mubr.msk.f32.mxu1 %vm1406_vm1, %v1405_v3 }
   0xd   :  { %1222 = vmatprep.subr.mxu1 %v1405_v3  ;;  %1234 = vmatpush3.msra.mxu0 %v1476_v5 }
   0xe   :  { %1223 = vmatpush3.msra.mxu1 %v1476_v5  ;;  %1235 = vmatprep.subr.mxu0 %v1405_v3 }
   0xf   :  { %1224 = vmatprep.subr.mxu1 %v1405_v3  ;;  %1236 = vmatpush3.msra.mxu0 %v1486_v7 }
  0x10   :  { %1225 = vmatpush3.msra.mxu1 %v1486_v7  ;;  %1237 = vmatprep.subr.mxu0 %v1405_v3 }
  0x11   :  { %1226 = vmatprep.subr.mxu1 %v1405_v3  ;;  %1238 = vmatpush3.msra.mxu0 %v1494_v8 }
  0x12   :  { %1227 = vmatpush3.msra.mxu1 %v1494_v8  ;;  %1253 = vmatprep.subr.mxu0 %v1405_v3 }
  0x13   :  { %1242 = vmatprep.subr.mxu1 %v1405_v3  ;;  %1200 = vmatprep.mubr.msk.f32.mxu0 %vm47_vm0, %v32_v47 }
  0x14   :  { %1201 = vmatmul.mubr.msk.f32.gmra.mxu0 %vm47_vm0, %v33_v48 }
  0x15   :  { %1203 = vmatprep.mubr.msk.f32.mxu0 %vm47_vm0, %v34_v49 }
  0x18   :  { %1204 = vmatmul.mubr.msk.f32.gmra.mxu0 %vm47_vm0, %v35_v50 }
  0x19   :  { %1206 = vmatprep.mubr.msk.f32.mxu0 %vm47_vm0, %v36_v51 }
  0x1c   :  { %1207 = vmatmul.mubr.msk.f32.gmra.mxu0 %vm47_vm0, %v37_v52 }
  0x1d   :  { %1239 = vmatprep.mubr.msk.f32.mxu0 %vm1406_vm1, %v1405_v3 }
  0xc6   :  { %v1199_v10 = vpop.f32.mrf.mxu0 }
  0xc7   :  { %v144_v33 = vadd.f32 %v1199_v10, %v1528_v11 }
  0xc8   :  { %v138_v12 = vpop.f32.mrf.mxu0 }
  0xc9   :  { %v139_v13 = vadd.f32 %v1528_v11, %v138_v12 }
  0xcb   :  { %v253_v14 = vpop.f32.mrf.mxu1 }
  0xcc   :  { %v257_v15 = vadd.f32 %v253_v14, %v139_v13 }
  0xcd   :  { %v1219_v16 = vpop.f32.mrf.mxu1 }
  0xce   :  { %1315 = vtanh.f32 %v257_v15  ;;  %v1121_v19 = vmul.f32 -1.442695, %v257_v15 }
  0xd0   :  { %1317 = vpow2.f32 %v1121_v19 }
  0xd4   :  { %v1202_v57 = vpop.f32.mrf.mxu0 }
  0xd6   :  { %v148_v58 = vpop.f32.mrf.mxu0 }
  0xd7   :  { %v149_v63 = vadd.f32 %v1528_v11, %v148_v58 }
  0xd8   :  { %v1592_v59 = vpop.f32.mrf.mxu0 }
  0xda   :  { %v1594_v60 = vpop.f32.mrf.mxu0 }
  0xdb   :  { %v1316_v17 = vpop.eup %1315 }
  0xdc   :  { %271 = vrot.lane.b32.xlu0 %v1316_v17, %s1407_s22  ;;  %v1596_v61 = vpop.f32.mrf.mxu0 }
  0xdd   :  { %v1318_v20 = vpop.eup %1317 }
  0xde   :  { %v261_v21 = vadd.f32 1.0, %v1318_v20  ;;  %v1598_v62 = vpop.f32.mrf.mxu0 }
  0xe0   :  { %266 = vrot.lane.b32.xlu0 %v182_v18, %s1407_s22  ;;  %1319 = vrcp.f32 %v261_v21 }
  0xed   :  { %v1320_v22 = vpop.eup %1319 }
 0x14e   :  { %v272_v23 = vpop.permute.xlu0 %271 }
 0x14f   :  { %v274_v24 = vmul.f32 %v1320_v22, %v272_v23  ;;  %v154_v23 = vadd.f32 %v1202_v57, %v1528_v11 }
 0x151   :  { %276 = vrot.lane.b32.xlu1 %v274_v24, %s1407_s22 }
 0x152   :  { %v267_v25 = vpop.permute.xlu0 %266 }
 0x153   :  { %v269_v26 = vmul.f32 %v1320_v22, %v267_v25 }
 0x1c3   :  { %v277_v27 = vpop.permute.xlu1 %276 }
 0x1c4   :  { %v279_v28 = vadd.f32 %v277_v27, %v269_v26 }
 0x1c6   :  { %1321 = vtanh.f32 %v279_v28 }
 0x1d3   :  { %v1322_v29 = vpop.eup %1321 }
 0x1d4   :  { %282 = vrot.lane.b32.xlu1 %v1322_v29, %s1407_s22 }
 0x246   :  { %v283_v30 = vpop.permute.xlu1 %282 }
 0x247   :  { %v285_v31 = vmul.f32 %v1320_v22, %v283_v30 }
 0x249   :  { %287 = vrot.lane.b32.xlu0 %v285_v31, %s1408_s2 }
 0x2bb   :  { %v288_v32 = vpop.permute.xlu0 %287 }
 0x2bc   :  { %1229 = vmatmul.mubr.msk.f32.vlgmr.msra.gmra.mxu1 %vm183_vm2, %v288_v32 }
 0x2bd   :  { %1243 = vmatpush3.msra.mxu1 %v1463_v1  ;;  %1250 = vmatprep.mubr.msk.f32.mxu1 %vm1406_vm1, %v1405_v3 }
 0x2be   :  { %1244 = vmatprep.subr.mxu1 %v1405_v3 }
 0x2bf   :  { %1245 = vmatpush3.msra.mxu1 %v1476_v5 }
 0x2c0   :  { %1246 = vmatprep.subr.mxu1 %v1405_v3 }
 0x2c1   :  { %1247 = vmatpush3.msra.mxu1 %v1486_v7 }
 0x2c2   :  { %1248 = vmatprep.subr.mxu1 %v1405_v3 }
 0x2c3   :  { %1249 = vmatpush3.msra.mxu1 %v1494_v8 }
 0x2c4   :  { %1264 = vmatprep.subr.mxu1 %v1405_v3 }
 0x37c   :  { %v357_v34 = vpop.f32.mrf.mxu1 }
 0x37d   :  { %v361_v35 = vadd.f32 %v357_v34, %v144_v33 }
 0x37e   :  { %v1230_v36 = vpop.f32.mrf.mxu1 }
 0x37f   :  { %1323 = vtanh.f32 %v361_v35  ;;  %v1123_v38 = vmul.f32 -1.442695, %v361_v35 }
 0x381   :  { %1325 = vpow2.f32 %v1123_v38 }
 0x38c   :  { %v1324_v37 = vpop.eup %1323 }
 0x38d   :  { %371 = vrot.lane.b32.xlu1 %v1324_v37, %s1407_s22 }
 0x38e   :  { %v1326_v39 = vpop.eup %1325 }
 0x38f   :  { %v365_v40 = vadd.f32 1.0, %v1326_v39 }
 0x391   :  { %1327 = vrcp.f32 %v365_v40 }
 0x39e   :  { %v1328_v41 = vpop.eup %1327 }
 0x39f   :  { %v369_v44 = vmul.f32 %v1328_v41, %v279_v28 }
 0x3ff   :  { %v372_v42 = vpop.permute.xlu1 %371 }
 0x400   :  { %v374_v43 = vmul.f32 %v1328_v41, %v372_v42 }
 0x402   :  { %376 = vrot.lane.b32.xlu0 %v374_v43, %s1407_s22 }
 0x474   :  { %v377_v45 = vpop.permute.xlu0 %376 }
 0x475   :  { %v379_v46 = vadd.f32 %v377_v45, %v369_v44 }
 0x477   :  { %1329 = vtanh.f32 %v379_v46 }
 0x484   :  { %v1330_v53 = vpop.eup %1329 }
 0x485   :  { %382 = vrot.lane.b32.xlu1 %v1330_v53, %s1407_s22 }
 0x4f7   :  { %v383_v54 = vpop.permute.xlu1 %382 }
 0x4f8   :  { %v385_v55 = vmul.f32 %v1328_v41, %v383_v54  ;;  %v159_v41 = vadd.f32 %v1528_v11, %v1594_v60  ;;  %v164_v60 = vadd.f32 %v1592_v59, %v1528_v11 }
 0x4fa   :  { %387 = vrot.lane.b32.xlu0 %v385_v55, %s1408_s2 }
 0x56c   :  { %v388_v56 = vpop.permute.xlu0 %387 }
 0x56d   :  { %1240 = vmatmul.mubr.msk.f32.vlgmr.msra.gmra.mxu0 %vm183_vm2, %v388_v56 }
 0x56e   :  { %1254 = vmatpush3.msra.mxu0 %v1463_v1  ;;  %1261 = vmatprep.mubr.msk.f32.mxu0 %vm1406_vm1, %v1405_v3 }
 0x56f   :  { %1255 = vmatprep.subr.mxu0 %v1405_v3 }
 0x570   :  { %1256 = vmatpush3.msra.mxu0 %v1476_v5 }
 0x571   :  { %1257 = vmatprep.subr.mxu0 %v1405_v3 }
 0x572   :  { %1258 = vmatpush3.msra.mxu0 %v1486_v7 }
 0x573   :  { %1259 = vmatprep.subr.mxu0 %v1405_v3 }
 0x574   :  { %1260 = vmatpush3.msra.mxu0 %v1494_v8 }
 0x575   :  { %1275 = vmatprep.subr.mxu0 %v1405_v3 }
 0x62d   :  { %v457_v0 = vpop.f32.mrf.mxu0 }
 0x62e   :  { %v461_v2 = vadd.f32 %v457_v0, %v149_v63 }
 0x62f   :  { %v1241_v4 = vpop.f32.mrf.mxu0 }
 0x630   :  { %1331 = vtanh.f32 %v461_v2  ;;  %v1125_v9 = vmul.f32 -1.442695, %v461_v2 }
 0x632   :  { %1333 = vpow2.f32 %v1125_v9 }
 0x63d   :  { %v1332_v6 = vpop.eup %1331 }
 0x63e   :  { %471 = vrot.lane.b32.xlu1 %v1332_v6, %s1407_s22 }
 0x63f   :  { %v1334_v10 = vpop.eup %1333 }
 0x640   :  { %v465_v12 = vadd.f32 1.0, %v1334_v10 }
 0x642   :  { %1335 = vrcp.f32 %v465_v12 }
 0x64f   :  { %v1336_v13 = vpop.eup %1335 }
 0x650   :  { %v469_v16 = vmul.f32 %v1336_v13, %v379_v46 }
 0x6b0   :  { %v472_v14 = vpop.permute.xlu1 %471 }
 0x6b1   :  { %v474_v15 = vmul.f32 %v1336_v13, %v472_v14 }
 0x6b3   :  { %476 = vrot.lane.b32.xlu0 %v474_v15, %s1407_s22 }
 0x725   :  { %v477_v17 = vpop.permute.xlu0 %476 }
 0x726   :  { %v479_v18 = vadd.f32 %v477_v17, %v469_v16  ;;  %v169_v17 = vadd.f32 %v1528_v11, %v1598_v62 }
 0x728   :  { %1337 = vtanh.f32 %v479_v18 }
 0x735   :  { %v1338_v19 = vpop.eup %1337 }
 0x736   :  { %482 = vrot.lane.b32.xlu1 %v1338_v19, %s1407_s22 }
 0x7a8   :  { %v483_v20 = vpop.permute.xlu1 %482 }
 0x7a9   :  { %v485_v21 = vmul.f32 %v1336_v13, %v483_v20 }
 0x7ab   :  { %487 = vrot.lane.b32.xlu0 %v485_v21, %s1408_s2 }
 0x81d   :  { %v488_v22 = vpop.permute.xlu0 %487 }
 0x81e   :  { %1251 = vmatmul.mubr.msk.f32.vlgmr.msra.gmra.mxu1 %vm183_vm2, %v488_v22 }
 0x81f   :  { %1265 = vmatpush3.msra.mxu1 %v1463_v1  ;;  %1272 = vmatprep.mubr.msk.f32.mxu1 %vm1406_vm1, %v1405_v3 }
 0x820   :  { %1266 = vmatprep.subr.mxu1 %v1405_v3 }
 0x821   :  { %1267 = vmatpush3.msra.mxu1 %v1476_v5 }
 0x822   :  { %1268 = vmatprep.subr.mxu1 %v1405_v3 }
 0x823   :  { %1269 = vmatpush3.msra.mxu1 %v1486_v7 }
 0x824   :  { %1270 = vmatprep.subr.mxu1 %v1405_v3 }
 0x825   :  { %1271 = vmatpush3.msra.mxu1 %v1494_v8 }
 0x826   :  { %1286 = vmatprep.subr.mxu1 %v1405_v3 }
 0x8de   :  { %v557_v24 = vpop.f32.mrf.mxu1 }
 0x8df   :  { %v561_v25 = vadd.f32 %v557_v24, %v154_v23 }
 0x8e0   :  { %v1252_v26 = vpop.f32.mrf.mxu1 }
 0x8e1   :  { %1339 = vtanh.f32 %v561_v25  ;;  %v1127_v28 = vmul.f32 -1.442695, %v561_v25 }
 0x8e3   :  { %1341 = vpow2.f32 %v1127_v28 }
 0x8ee   :  { %v1340_v27 = vpop.eup %1339 }
 0x8ef   :  { %571 = vrot.lane.b32.xlu1 %v1340_v27, %s1407_s22 }
 0x8f0   :  { %v1342_v29 = vpop.eup %1341 }
 0x8f1   :  { %v565_v30 = vadd.f32 1.0, %v1342_v29 }
 0x8f3   :  { %1343 = vrcp.f32 %v565_v30 }
 0x900   :  { %v1344_v31 = vpop.eup %1343 }
 0x901   :  { %v569_v34 = vmul.f32 %v1344_v31, %v479_v18 }
 0x961   :  { %v572_v32 = vpop.permute.xlu1 %571 }
 0x962   :  { %v574_v33 = vmul.f32 %v1344_v31, %v572_v32 }
 0x964   :  { %576 = vrot.lane.b32.xlu0 %v574_v33, %s1407_s22 }
 0x9d6   :  { %v577_v35 = vpop.permute.xlu0 %576 }
 0x9d7   :  { %v579_v36 = vadd.f32 %v577_v35, %v569_v34  ;;  %v174_v34 = vadd.f32 %v1596_v61, %v1528_v11  ;;  %v989_v61 = vld [vmem:[%s1701_s6 + $0x18] sm:$0xff] }
 0x9d9   :  { %1345 = vtanh.f32 %v579_v36 }
 0x9e6   :  { %v1346_v37 = vpop.eup %1345 }
 0x9e7   :  { %582 = vrot.lane.b32.xlu1 %v1346_v37, %s1407_s22 }
 0xa59   :  { %v583_v38 = vpop.permute.xlu1 %582 }
 0xa5a   :  { %v585_v39 = vmul.f32 %v1344_v31, %v583_v38 }
 0xa5c   :  { %587 = vrot.lane.b32.xlu0 %v585_v39, %s1408_s2 }
 0xace   :  { %v588_v40 = vpop.permute.xlu0 %587 }
 0xacf   :  { %1262 = vmatmul.mubr.msk.f32.vlgmr.msra.gmra.mxu0 %vm183_vm2, %v588_v40 }
 0xad0   :  { %1276 = vmatpush3.msra.mxu0 %v1463_v1  ;;  %1283 = vmatprep.mubr.msk.f32.mxu0 %vm1406_vm1, %v1405_v3 }
 0xad1   :  { %1277 = vmatprep.subr.mxu0 %v1405_v3 }
 0xad2   :  { %1278 = vmatpush3.msra.mxu0 %v1476_v5 }
 0xad3   :  { %1279 = vmatprep.subr.mxu0 %v1405_v3 }
 0xad4   :  { %1280 = vmatpush3.msra.mxu0 %v1486_v7 }
 0xad5   :  { %1281 = vmatprep.subr.mxu0 %v1405_v3 }
 0xad6   :  { %1282 = vmatpush3.msra.mxu0 %v1494_v8 }
 0xad7   :  { %1297 = vmatprep.subr.mxu0 %v1405_v3 }
 0xb8f   :  { %v657_v42 = vpop.f32.mrf.mxu0 }
 0xb90   :  { %v661_v43 = vadd.f32 %v657_v42, %v159_v41 }
 0xb91   :  { %v1263_v44 = vpop.f32.mrf.mxu0 }
 0xb92   :  { %1347 = vtanh.f32 %v661_v43  ;;  %v1129_v46 = vmul.f32 -1.442695, %v661_v43 }
 0xb94   :  { %1349 = vpow2.f32 %v1129_v46 }
 0xb9f   :  { %v1348_v45 = vpop.eup %1347 }
 0xba0   :  { %671 = vrot.lane.b32.xlu1 %v1348_v45, %s1407_s22 }
 0xba1   :  { %v1350_v47 = vpop.eup %1349 }
 0xba2   :  { %v665_v48 = vadd.f32 1.0, %v1350_v47  ;;  %v988_v47 = vld [vmem:[%s1701_s6 + $0x10] sm:$0xff] }
 0xba4   :  { %1351 = vrcp.f32 %v665_v48  ;;  %v987_v48 = vld [vmem:[%s1701_s6 + $0x8] sm:$0xff] }
 0xbb1   :  { %v1352_v49 = vpop.eup %1351 }
 0xbb2   :  { %v669_v52 = vmul.f32 %v1352_v49, %v579_v36 }
 0xc12   :  { %v672_v50 = vpop.permute.xlu1 %671 }
 0xc13   :  { %v674_v51 = vmul.f32 %v1352_v49, %v672_v50 }
 0xc15   :  { %676 = vrot.lane.b32.xlu0 %v674_v51, %s1407_s22 }
 0xc87   :  { %v677_v53 = vpop.permute.xlu0 %676 }
 0xc88   :  { %v679_v54 = vadd.f32 %v677_v53, %v669_v52 }
 0xc8a   :  { %1353 = vtanh.f32 %v679_v54 }
 0xc97   :  { %v1354_v55 = vpop.eup %1353 }
 0xc98   :  { %682 = vrot.lane.b32.xlu1 %v1354_v55, %s1407_s22 }
 0xd0a   :  { %v683_v56 = vpop.permute.xlu1 %682 }
 0xd0b   :  { %v685_v57 = vmul.f32 %v1352_v49, %v683_v56  ;;  %v986_v49 = vld [vmem:[%s1701_s6] sm:$0xff]  ;;  %s1409_s6 = smov 16  }
 0xd0d   :  { %687 = vrot.lane.b32.xlu0 %v685_v57, %s1408_s2 }
 0xd7f   :  { %v688_v58 = vpop.permute.xlu0 %687 }
 0xd80   :  { %1273 = vmatmul.mubr.msk.f32.vlgmr.msra.gmra.mxu1 %vm183_vm2, %v688_v58 }
 0xd81   :  { %1287 = vmatpush3.msra.mxu1 %v1463_v1  ;;  %1294 = vmatprep.mubr.msk.f32.mxu1 %vm1406_vm1, %v1405_v3 }
 0xd82   :  { %1288 = vmatprep.subr.mxu1 %v1405_v3 }
 0xd83   :  { %1289 = vmatpush3.msra.mxu1 %v1476_v5 }
 0xd84   :  { %1290 = vmatprep.subr.mxu1 %v1405_v3 }
 0xd85   :  { %1291 = vmatpush3.msra.mxu1 %v1486_v7 }
 0xd86   :  { %1292 = vmatprep.subr.mxu1 %v1405_v3 }
 0xd87   :  { %1293 = vmatpush3.msra.mxu1 %v1494_v8 }
 0xe40   :  { %v757_v63 = vpop.f32.mrf.mxu1 }
 0xe41   :  { %v761_v1 = vadd.f32 %v757_v63, %v164_v60 }
 0xe42   :  { %v1274_v0 = vpop.f32.mrf.mxu1 }
 0xe43   :  { %1355 = vtanh.f32 %v761_v1  ;;  %v1131_v4 = vmul.f32 -1.442695, %v761_v1 }
 0xe45   :  { %1357 = vpow2.f32 %v1131_v4 }
 0xe50   :  { %v1356_v2 = vpop.eup %1355 }
 0xe51   :  { %771 = vrot.lane.b32.xlu1 %v1356_v2, %s1407_s22 }
 0xe52   :  { %v1358_v5 = vpop.eup %1357 }
 0xe53   :  { %v765_v6 = vadd.f32 1.0, %v1358_v5 }
 0xe55   :  { %1359 = vrcp.f32 %v765_v6 }
 0xe62   :  { %v1360_v7 = vpop.eup %1359 }
 0xe63   :  { %v769_v8 = vmul.f32 %v1360_v7, %v679_v54  ;;  %v1136_v54 = vld [vmem:[%s1702_s7] ss:$0 sm:$0xff]  ;;  %s1411_s7 = smov [#allocation2]  }
 0xe64   :  { %s1103_s5 = sshll.u32 %s1411_s7, 4  ;;  %s1104_s5 = int_to_ptr.vmem [resolvable:$true] %s1103_s5 }
 0xe65   :  { %p1388_p1 = scmp.lt.s32.totalorder %s1104_s5, %s1104_s5 }
 0xec3   :  { %v772_v9 = vpop.permute.xlu1 %771 }
 0xec4   :  { %v774_v10 = vmul.f32 %v1360_v7, %v772_v9 }
 0xec6   :  { %776 = vrot.lane.b32.xlu0 %v774_v10, %s1407_s22 }
 0xf38   :  { %v777_v12 = vpop.permute.xlu0 %776 }
 0xf39   :  { %v779_v59 = vadd.f32 %v777_v12, %v769_v8 }
 0xf3b   :  { %1361 = vtanh.f32 %v779_v59 }
 0xf48   :  { %v1362_v13 = vpop.eup %1361 }
 0xf49   :  { %782 = vrot.lane.b32.xlu1 %v1362_v13, %s1407_s22 }
 0xfbb   :  { %v783_v14 = vpop.permute.xlu1 %782 }
 0xfbc   :  { %v785_v15 = vmul.f32 %v1360_v7, %v783_v14 }
 0xfbe   :  { %787 = vrot.lane.b32.xlu0 %v785_v15, %s1408_s2 }
0x1030   :  { %v788_v16 = vpop.permute.xlu0 %787 }
0x1031   :  { %1284 = vmatmul.mubr.msk.f32.vlgmr.msra.gmra.mxu0 %vm183_vm2, %v788_v16 }
0x1032   :  { %1305 = vmatprep.mubr.msk.f32.mxu0 %vm1406_vm1, %v1405_v3  ;;  %1298 = vmatpush3.msra.mxu0 %v989_v61 }
0x1033   :  { %1299 = vmatprep.subr.mxu0 %v1405_v3 }
0x1034   :  { %1300 = vmatpush3.msra.mxu0 %v988_v47 }
0x1035   :  { %1301 = vmatprep.subr.mxu0 %v1405_v3 }
0x1036   :  { %1302 = vmatpush3.msra.mxu0 %v987_v48 }
0x1037   :  { %1303 = vmatprep.subr.mxu0 %v1405_v3 }
0x1038   :  { %1304 = vmatpush3.msra.mxu0 %v986_v49 }
0x10f1   :  { %v857_v18 = vpop.f32.mrf.mxu0 }
0x10f2   :  { %v861_v19 = vadd.f32 %v857_v18, %v169_v17 }
0x10f3   :  { %v1285_v20 = vpop.f32.mrf.mxu0 }
0x10f4   :  { %1363 = vtanh.f32 %v861_v19  ;;  %v1133_v22 = vmul.f32 -1.442695, %v861_v19 }
0x10f6   :  { %1365 = vpow2.f32 %v1133_v22 }
0x1101   :  { %v1364_v21 = vpop.eup %1363 }
0x1102   :  { %871 = vrot.lane.b32.xlu1 %v1364_v21, %s1407_s22 }
0x1103   :  { %v1366_v23 = vpop.eup %1365 }
0x1104   :  { %v865_v24 = vadd.f32 1.0, %v1366_v23 }
0x1106   :  { %1367 = vrcp.f32 %v865_v24 }
0x1113   :  { %v1368_v25 = vpop.eup %1367 }
0x1114   :  { %v869_v28 = vmul.f32 %v1368_v25, %v779_v59 }
0x1174   :  { %v872_v26 = vpop.permute.xlu1 %871 }
0x1175   :  { %v874_v27 = vmul.f32 %v1368_v25, %v872_v26 }
0x1177   :  { %876 = vrot.lane.b32.xlu0 %v874_v27, %s1407_s22 }
0x11e9   :  { %v877_v29 = vpop.permute.xlu0 %876 }
0x11ea   :  { %v879_v62 = vadd.f32 %v877_v29, %v869_v28 }
0x11ec   :  { %1369 = vtanh.f32 %v879_v62 }
0x11f9   :  { %v1370_v30 = vpop.eup %1369 }
0x11fa   :  { %882 = vrot.lane.b32.xlu1 %v1370_v30, %s1407_s22 }
0x126c   :  { %v883_v31 = vpop.permute.xlu1 %882 }
0x126d   :  { %v885_v32 = vmul.f32 %v1368_v25, %v883_v31 }
0x126f   :  { %887 = vrot.lane.b32.xlu0 %v885_v32, %s1408_s2 }
0x12e1   :  { %v888_v33 = vpop.permute.xlu0 %887 }
0x12e2   :  { %1295 = vmatmul.mubr.msk.f32.vlgmr.msra.gmra.mxu1 %vm183_vm2, %v888_v33 }
0x13a2   :  { %v957_v35 = vpop.f32.mrf.mxu1 }
0x13a3   :  { %v961_v36 = vadd.f32 %v957_v35, %v174_v34 }
0x13a4   :  { %v1296_v37 = vpop.f32.mrf.mxu1 }
0x13a5   :  { %1371 = vtanh.f32 %v961_v36  ;;  %v1135_v39 = vmul.f32 -1.442695, %v961_v36 }
0x13a7   :  { %1373 = vpow2.f32 %v1135_v39 }
0x13b2   :  { %v1372_v38 = vpop.eup %1371 }
0x13b3   :  { %971 = vrot.lane.b32.xlu1 %v1372_v38, %s1407_s22 }
0x13b4   :  { %v1374_v40 = vpop.eup %1373 }
0x13b5   :  { %v965_v41 = vadd.f32 1.0, %v1374_v40 }
0x13b7   :  { %1375 = vrcp.f32 %v965_v41 }
0x13c4   :  { %v1376_v42 = vpop.eup %1375 }
0x13c5   :  { %v969_v45 = vmul.f32 %v1376_v42, %v879_v62 }
0x1425   :  { %v972_v43 = vpop.permute.xlu1 %971 }
0x1426   :  { %v974_v44 = vmul.f32 %v1376_v42, %v972_v43 }
0x1428   :  { %976 = vrot.lane.b32.xlu0 %v974_v44, %s1407_s22 }
0x149a   :  { %v977_v46 = vpop.permute.xlu0 %976 }
0x149b   :  { %v979_v11 = vadd.f32 %v977_v46, %v969_v45 }
0x149d   :  { %1377 = vtanh.f32 %v979_v11 }
0x14aa   :  { %v1378_v50 = vpop.eup %1377 }
0x14ab   :  { %982 = vrot.lane.b32.xlu1 %v1378_v50, %s1407_s22  ;;  %s1383_s22 = scalar_lea.vmem %s1104_s5, 128 }
0x14ac   :  { %p1384_p0 = scmp.ne.s32.totalorder %s1104_s5, %s1383_s22  ;;  %p1389_p2 = scmp.lt.s32.totalorder %s1383_s22, %s1383_s22 }
0x14ae   :  { %p1390_p3 = por %p1389_p2, %p1388_p1 }
0x14b0   :  { %p1391_p4 = pnand %p1390_p3, %p1384_p0 }
0x151d   :  { %v983_v51 = vpop.permute.xlu1 %982 }
0x151e   :  { %v985_v52 = vmul.f32 %v1376_v42, %v983_v51 }
0x1520   :  { %998 = vrot.lane.b32.xlu0 %v985_v52, %s1408_s2 }
0x1592   :  { %v999_v53 = vpop.permute.xlu0 %998 }
0x1593   :  { %1306 = vmatmul.mubr.msk.f32.vlgmr.msra.gmra.mxu0 %vm183_vm2, %v999_v53 }
0x1653   :  { %v1068_v55 = vpop.f32.mrf.mxu0 }
0x1654   :  { %v1069_v56 = vadd.f32 %v1136_v54, %v1068_v55 }
0x1655   :  { %v1307_v57 = vpop.f32.mrf.mxu0 }
0x1656   :  { %v1072_v3 = vsel %vm47_vm0, %v1069_v56, -inf }
0x1657   :  { %1073 = vmax.xlane.f32.xlu1 %v1072_v3 }
0x1668   :  { %1088 = vrot.lane.b32.xlu1 %v979_v11, %s1409_s6 }
0x16e0   :  { %v1074_v58 = vpop.xlane.xlu1 %1073 }
0x16e1   :  { %v1075_v60 = vsub.f32 %v1069_v56, %v1074_v58 }
0x16e3   :  { %v1076_v63 = vmul.f32 1.442695, %v1075_v60 }
0x16e4   :  { %v1089_v9 = vpop.permute.xlu1 %1088 }
0x16e5   :  { %1379 = vpow2.f32 %v1076_v63 }
0x16f2   :  { %v1380_v1 = vpop.eup %1379 }
0x16f3   :  { %v1078_v0 = vsel %vm47_vm0, %v1380_v1, 0.0 }
0x16f4   :  { %1079 = vadd.xlane.f32.xlu0 %v1078_v0 }
0x170a   :  { %1084 = vrot.lane.b32.xlu0 %v985_v52, %s1410_s1 }
0x177d   :  { %v1080_v2 = vpop.xlane.xlu0 %1079 }
0x177e   :  { %1381 = vlog2.f32 %v1080_v2 }
0x1781   :  { %v1085_v7 = vpop.permute.xlu0 %1084 }
0x178b   :  { %v1382_v4 = vpop.eup %1381 }
0x178c   :  { %v1082_v5 = vmul.f32 0.6931472, %v1382_v4 }
0x178e   :  { %v1083_v6 = vsub.f32 %v1075_v60, %v1082_v5 }
0x1790   :  { %v1091_v10 = vsel %vm47_vm0, %v1083_v6, %v1085_v7 }
0x1791   :  { %v1093_v8 = vsel %vm1092_vm3, %v1091_v10, %v1089_v9 }
0x1792   :  { %v1095_v12 = vsel %vm1094_vm4, %v1093_v8, 0.0 }
0x1793   :  { %1096 = vst [vmem:[#allocation2] sm:$0xff] %v1095_v12 }
0x1794   :  { %1394 = shalt.err (!%p1391_p4)
}
0x1795   :  { %1106 = dma.vmem_to_hbm [thread:$0]  %s1104_s5, 128, %s1703_s8, [#allocation3]  }
0x1796   :  { %1403 = dma.done.wait [#allocation3], 128  }
0x1797   :  { %1404 = vsyncadd [#allocation3], 4294967168 }
0x1798   :  { %1110 = vsyncpa [#allocation3], 1 }

</bundles_post_ra>
